<compile_context>
chip_gen: v7x
topology: tpu7x:2x2x1
jax: 0.10.0
libtpu: 0.0.40
codegen_flags: <defaults>
</compile_context>

<pallas_src>
import functools

import jax
import jax.numpy as jnp
from jax.experimental import pallas as pl
from jax.experimental.pallas import tpu as pltpu


def _prop_kernel(at_ref, xt_ref, bias_ref, yt_ref, ybuf,
                 *, alp, lam, tn, compute_dtype):
    """Grid = (prop_step, N // tn): one destination-column tile of one unfolding step.

    yt_ref : resident (D, N) f32 output block.  Always holds the *current* step's Y^T;
             column tiles >= the current one still hold the previous step's values.
    ybuf   : (D, N) compute-dtype scratch.  Snapshot of the *previous* step's Y^T,
             refreshed once per step (at j == 0); used as the matmul LHS.
    """
    k = pl.program_id(0)   # unfolding step (sequential dependence)
    j = pl.program_id(1)   # destination-node column tile (shares resident state)

    # ---- once per step: refresh the matmul-LHS snapshot --------------------------
    @pl.when(jnp.logical_and(k == 0, j == 0))
    def _():
        x_full = xt_ref[...]
        yt_ref[...] = x_full                              # Y_0 = X
        ybuf[...] = x_full.astype(compute_dtype)

    @pl.when(jnp.logical_and(k > 0, j == 0))
    def _():
        ybuf[...] = yt_ref[...].astype(compute_dtype)     # snapshot Y_{k-1}

    off = pl.multiple_of(j * tn, tn)

    # (A_norm @ Y) for this destination tile, computed transposed as Y^T @ A_norm^T so
    # the MXU output tile (D, TN) is lane-dense.  f32 accumulation.
    az = jnp.dot(ybuf[...], at_ref[...], preferred_element_type=jnp.float32)  # (D, TN)

    # Previous-step values of this column tile (still untouched in the output block).
    yp_tile = yt_ref[:, pl.ds(off, tn)]                                       # (D, TN)

    yt_ref[:, pl.ds(off, tn)] = ((1.0 - alp) * yp_tile
                                 + (alp * lam) * az
                                 + bias_ref[...]).astype(yt_ref.dtype)


def gnn_model_forward(adj, x, *, prop_step=8, alp=0.0, lam=1.0,
                      use_bf16_adjacency=True):
    """Pallas implementation of GNNModel.forward(g, x) with the default flags.

    adj: (N, N) dense adjacency, adj[i, j] = 1.0 iff there is an edge j -> i.
    x:   (N, D) node features.
    """
    n, d = x.shape
    assert adj.shape == (n, n)
    assert prop_step >= 1

    # alp == 0 -> auto alpha = 1 / (lam + 1), as in UnfoldindAndAttention.__init__
    alp_eff = float(alp) if alp > 0 else 1.0 / (float(lam) + 1.0)
    lam = float(lam)

    adj32 = adj.astype(jnp.float32)
    x32 = x.astype(jnp.float32)

    # One-shot preprocessing (amortized over all prop steps):
    deg = jnp.sum(adj32, axis=1, keepdims=True)                  # (N, 1) in-degrees
    d_half = jnp.power(lam * deg + 1.0, -0.5)                    # (lam*D + I)^{-1/2}
    d_inv = jnp.power(lam * deg + 1.0, -1.0)                     # (lam*D + I)^{-1}

    a_norm = (d_half * adj32) * d_half.T                         # D^{-1/2} A D^{-1/2}
    bias = alp_eff * (d_inv * x32)                               # alp * (lam*D+I)^{-1} X

    compute_dtype = jnp.bfloat16 if use_bf16_adjacency else jnp.float32
    abytes = 2 if use_bf16_adjacency else 4

    # Lane-dense transposed operands (node axis on lanes).
    at = jnp.transpose(a_norm).astype(compute_dtype)             # (N_src, N_dst)
    xt = jnp.transpose(x32)                                      # (D, N)
    bias_t = jnp.transpose(bias)                                 # (D, N)

    # Column tile: largest of {512, 256, 128} dividing N whose double-buffered A tile
    # stays well inside VMEM; fall back to a single full-width tile for small/odd N.
    tn = None
    for cand in (512, 256, 128):
        if n % cand == 0 and 2 * n * cand * abytes <= (24 << 20):
            tn = cand
            break
    if tn is None:
        tn = n
    assert n % tn == 0
    n_tiles = n // tn

    kernel = functools.partial(
        _prop_kernel, alp=alp_eff, lam=lam, tn=tn, compute_dtype=compute_dtype)

    grid_spec = pltpu.PrefetchScalarGridSpec(
        num_scalar_prefetch=0,
        grid=(int(prop_step), n_tiles),
        in_specs=[
            pl.BlockSpec((n, tn), lambda k, j: (0, j)),   # A_norm^T column tile
            pl.BlockSpec((d, n), lambda k, j: (0, 0)),    # X^T (resident seed)
            pl.BlockSpec((d, tn), lambda k, j: (0, j)),   # bias^T tile
        ],
        out_specs=pl.BlockSpec((d, n), lambda k, j: (0, 0)),   # Y^T (resident state)
        scratch_shapes=[
            pltpu.VMEM((d, n), compute_dtype),            # previous-step Y^T (MXU LHS)
        ],
    )

    # Explicit VMEM budget sized to the real working set with headroom.
    working_set = (2 * n * tn * abytes          # A_norm^T tiles (double-buffered)
                   + 2 * d * n * 4              # X^T
                   + 2 * d * tn * 4             # bias tiles
                   + 2 * d * n * 4              # resident output Y^T
                   + d * n * abytes)            # LHS snapshot scratch
    vmem_limit = int(min(max(2 * working_set + (2 << 20), 16 << 20), 64 << 20))

    cost = pl.CostEstimate(
        flops=int(2 * prop_step * n * n * d + 4 * prop_step * n * d),
        transcendentals=0,
        bytes_accessed=int(prop_step * n * n * abytes + 4 * n * d * 4),
    )

    yt = pl.pallas_call(
        kernel,
        out_shape=jax.ShapeDtypeStruct((d, n), jnp.float32),
        grid_spec=grid_spec,
        compiler_params=pltpu.CompilerParams(
            dimension_semantics=("arbitrary", "arbitrary"),
            vmem_limit_bytes=vmem_limit,
        ),
        cost_estimate=cost,
    )(at, xt, bias_t)

    return jnp.transpose(yt).astype(x.dtype)                     # back to (N, D)


def _reference_forward(adj, x, *, prop_step=8, alp=0.0, lam=1.0):
    """Pure-JAX reference mirroring the PyTorch Propagate loop (f32, highest precision)."""
    alp_eff = float(alp) if alp > 0 else 1.0 / (float(lam) + 1.0)
    lam = float(lam)
    deg = jnp.sum(adj, axis=1, keepdims=True)
    d_half = jnp.power(lam * deg + 1.0, -0.5)
    d_inv = jnp.power(lam * deg + 1.0, -1.0)
    y = x
    for _ in range(prop_step):
        prop = d_half * jnp.dot(adj, d_half * y,
                                precision=jax.lax.Precision.HIGHEST)
        y = (1.0 - alp_eff) * y + alp_eff * lam * prop + alp_eff * (d_inv * x)
    return y


if __name__ == "__main__":
    key = jax.random.PRNGKey(0)
    k_adj, k_x = jax.random.split(key)

    N = 384        # nodes (three 128-lane column tiles -> exercises the tiled grid)
    D = 32         # input_d (feature dim)
    PROP_STEP = 8  # prop_step

    # Deterministic synthetic graph: random sparse-ish adjacency + self loops.
    a = (jax.random.uniform(k_adj, (N, N)) < 0.05).astype(jnp.float32)
    adj = jnp.maximum(a, jnp.eye(N, dtype=jnp.float32))   # edge weights all 1.0
    x = jax.random.normal(k_x, (N, D), dtype=jnp.float32)

    ref = _reference_forward(adj, x, prop_step=PROP_STEP, alp=0.0, lam=1.0)

    # f32-adjacency path (faithful to the module up to matmul rounding / fold order).
    out_f32 = gnn_model_forward(adj, x, prop_step=PROP_STEP, alp=0.0, lam=1.0,
                                use_bf16_adjacency=False)
    out_f32 = jax.block_until_ready(out_f32)
    assert out_f32.shape == (N, D)
    err_f32 = float(jnp.max(jnp.abs(out_f32 - ref)))
    assert err_f32 < 1e-2, f"f32 path error too large: {err_f32}"

    # bf16-adjacency fast path (only the normalized A and the matmul LHS are rounded;
    # accumulation and all element-wise state stay f32).
    out_bf16 = gnn_model_forward(adj, x, prop_step=PROP_STEP, alp=0.0, lam=1.0,
                                 use_bf16_adjacency=True)
    out_bf16 = jax.block_until_ready(out_bf16)
    assert out_bf16.shape == (N, D)
    err_bf16 = float(jnp.max(jnp.abs(out_bf16 - ref)))
    tol_bf16 = 5e-2 * (1.0 + float(jnp.max(jnp.abs(ref))))
    assert err_bf16 < tol_bf16, f"bf16 path error too large: {err_bf16} (tol {tol_bf16})"

    print("KERNEL_OK")
</pallas_src>

<mosaic_0001>
module attributes {stable_mosaic.version = 11 : i64} {
  func.func @_prop_kernel(%arg0: i32, %arg1: i32, %arg2: memref<384x128xf32, #tpu.memory_space<vmem>>, %arg3: memref<32x384xf32, #tpu.memory_space<vmem>>, %arg4: memref<32x128xf32, #tpu.memory_space<vmem>>, %arg5: memref<32x384xf32, #tpu.memory_space<vmem>>, %arg6: memref<32x384xf32, #tpu.memory_space<vmem>>) attributes {dimension_semantics = [#tpu.dimension_semantics<arbitrary>, #tpu.dimension_semantics<arbitrary>], iteration_bounds = array<i64: 8, 3>, scalar_prefetch = 0 : i64, scratch_operands = 1 : i64, tpu.core_type = #tpu.core_type<tc>, window_params = [{transform_indices = @transform_0, window_bounds = array<i64: 384, 128>}, {pipeline_mode = #tpu.pipeline_mode<synchronous>, transform_indices = @transform_1, window_bounds = array<i64: 32, 384>}, {transform_indices = @transform_2, window_bounds = array<i64: 32, 128>}, {pipeline_mode = #tpu.pipeline_mode<synchronous>, transform_indices = @transform_3, window_bounds = array<i64: 32, 384>}]} {
    %c0_i32 = arith.constant 0 : i32
    %0 = arith.cmpi eq, %arg0, %c0_i32 : i32
    %c0_i32_0 = arith.constant 0 : i32
    %1 = arith.cmpi eq, %arg1, %c0_i32_0 : i32
    %2 = arith.andi %0, %1 : i1
    %3 = arith.extui %2 : i1 to i32
    %c0_i32_1 = arith.constant 0 : i32
    %4 = arith.cmpi ne, %3, %c0_i32_1 : i32
    scf.if %4 {
      %c0_14 = arith.constant 0 : index
      %c0_15 = arith.constant 0 : index
      %26 = vector.load %arg3[%c0_14, %c0_15] : memref<32x384xf32, #tpu.memory_space<vmem>>, vector<32x384xf32>
      %c0_16 = arith.constant 0 : index
      %c0_17 = arith.constant 0 : index
      %27 = vector.load %arg5[%c0_16, %c0_17] : memref<32x384xf32, #tpu.memory_space<vmem>>, vector<32x384xf32>
      tpu.vector_store %arg5[%c0_16, %c0_17], %26 {strides = array<i32>} : memref<32x384xf32, #tpu.memory_space<vmem>>, vector<32x384xf32>,
      %c0_18 = arith.constant 0 : index
      %c0_19 = arith.constant 0 : index
      %28 = vector.load %arg6[%c0_18, %c0_19] : memref<32x384xf32, #tpu.memory_space<vmem>>, vector<32x384xf32>
      tpu.vector_store %arg6[%c0_18, %c0_19], %26 {strides = array<i32>} : memref<32x384xf32, #tpu.memory_space<vmem>>, vector<32x384xf32>,
    } else {
    }
    %c0_i32_2 = arith.constant 0 : i32
    %5 = arith.cmpi sgt, %arg0, %c0_i32_2 : i32
    %c0_i32_3 = arith.constant 0 : i32
    %6 = arith.cmpi eq, %arg1, %c0_i32_3 : i32
    %7 = arith.andi %5, %6 : i1
    %8 = arith.extui %7 : i1 to i32
    %c0_i32_4 = arith.constant 0 : i32
    %9 = arith.cmpi ne, %8, %c0_i32_4 : i32
    scf.if %9 {
      %c0_14 = arith.constant 0 : index
      %c0_15 = arith.constant 0 : index
      %26 = vector.load %arg5[%c0_14, %c0_15] : memref<32x384xf32, #tpu.memory_space<vmem>>, vector<32x384xf32>
      %c0_16 = arith.constant 0 : index
      %c0_17 = arith.constant 0 : index
      %27 = vector.load %arg6[%c0_16, %c0_17] : memref<32x384xf32, #tpu.memory_space<vmem>>, vector<32x384xf32>
      tpu.vector_store %arg6[%c0_16, %c0_17], %26 {strides = array<i32>} : memref<32x384xf32, #tpu.memory_space<vmem>>, vector<32x384xf32>,
    } else {
    }
    %c128_i32 = arith.constant 128 : i32
    %10 = arith.muli %arg1, %c128_i32 : i32
    %11 = tpu.assume_multiple %10, 128 : i32
    %c0 = arith.constant 0 : index
    %c0_5 = arith.constant 0 : index
    %12 = vector.load %arg6[%c0, %c0_5] : memref<32x384xf32, #tpu.memory_space<vmem>>, vector<32x384xf32>
    %c0_6 = arith.constant 0 : index
    %c0_7 = arith.constant 0 : index
    %13 = vector.load %arg2[%c0_6, %c0_7] : memref<384x128xf32, #tpu.memory_space<vmem>>, vector<384x128xf32>
    %cst = arith.constant dense<0.000000e+00> : vector<32x128xf32>
    %14 = tpu.matmul %12, %13, %cst {dimension_numbers = #tpu.dot_dimension_numbers<[1], [0], [0], [1], [0, 0, 1, 1], [], []>} : vector<32x384xf32>, vector<384x128xf32>, vector<32x128xf32> -> vector<32x128xf32>
    %c0_8 = arith.constant 0 : index
    %15 = arith.index_cast %11 : i32 to index
    %16 = vector.load %arg5[%c0_8, %15] : memref<32x384xf32, #tpu.memory_space<vmem>>, vector<32x128xf32>
    %cst_9 = arith.constant 5.000000e-01 : f32
    %17 = vector.broadcast %cst_9 : f32 to vector<32x128xf32>
    %18 = arith.mulf %17, %16 : vector<32x128xf32>
    %cst_10 = arith.constant 5.000000e-01 : f32
    %19 = vector.broadcast %cst_10 : f32 to vector<32x128xf32>
    %20 = arith.mulf %19, %14 : vector<32x128xf32>
    %21 = arith.addf %18, %20 : vector<32x128xf32>
    %c0_11 = arith.constant 0 : index
    %c0_12 = arith.constant 0 : index
    %22 = vector.load %arg4[%c0_11, %c0_12] : memref<32x128xf32, #tpu.memory_space<vmem>>, vector<32x128xf32>
    %23 = arith.addf %21, %22 : vector<32x128xf32>
    %c0_13 = arith.constant 0 : index
    %24 = arith.index_cast %11 : i32 to index
    %25 = vector.load %arg5[%c0_13, %24] : memref<32x384xf32, #tpu.memory_space<vmem>>, vector<32x128xf32>
    tpu.vector_store %arg5[%c0_13, %24], %23 {strides = array<i32>} : memref<32x384xf32, #tpu.memory_space<vmem>>, vector<32x128xf32>,
    return
  }
  func.func @transform_0(%arg0: i32, %arg1: i32) -> (i32, i32) {
    %c0_i32 = arith.constant 0 : i32
    %c0_i32_0 = arith.constant 0 : i32
    return %c0_i32, %arg1 : i32, i32
  }
  func.func @transform_1(%arg0: i32, %arg1: i32) -> (i32, i32) {
    %c0_i32 = arith.constant 0 : i32
    %c0_i32_0 = arith.constant 0 : i32
    %c0_i32_1 = arith.constant 0 : i32
    return %c0_i32, %c0_i32_0 : i32, i32
  }
  func.func @transform_2(%arg0: i32, %arg1: i32) -> (i32, i32) {
    %c0_i32 = arith.constant 0 : i32
    %c0_i32_0 = arith.constant 0 : i32
    return %c0_i32, %arg1 : i32, i32
  }
  func.func @transform_3(%arg0: i32, %arg1: i32) -> (i32, i32) {
    %c0_i32 = arith.constant 0 : i32
    %c0_i32_0 = arith.constant 0 : i32
    %c0_i32_1 = arith.constant 0 : i32
    return %c0_i32, %c0_i32_0 : i32, i32
  }
}

</mosaic_0001>

<bundles_post_ra>
// kernel: tpu_custom_call.1
= control target key start
LH: loop header
LB: loop body
LE: loop exit
PB: predicated region body
PF: predicated region fallthrough
CT: control target
= control target key end

     0   :  { %8 = vsyncpa [#allocation4], 0  ;;  %s1519_s0 = inlined_call_operand.hbm [shape: f32[384,384], index: 0, kind: input, shape index: {}]   ;;  %s1520_s1 = inlined_call_operand.hbm [shape: f32[32,384], index: 1, kind: input, shape index: {}]   ;;  %s1521_s2 = inlined_call_operand.hbm [shape: f32[32,384], index: 2, kind: input, shape index: {}]   ;;  %s1522_s3 = inlined_call_operand.hbm [shape: f32[32,384], index: 3, kind: output, shape index: {}]  }
   0x1   :  { %10 = vsyncpa [#allocation4 + $0x1], 0 }
   0x2   :  { %11 = vsyncpa [#allocation7], 0 }
   0x3   :  { %12 = vsyncpa [#allocation5], 0  ;;  %s1184_s12 = smov 0   ;;  %s1186_s13 = smov 0  }
   0x4   :  { %s1188_s14 = smov 0   ;;  %s1190_s15 = smov 0  }
   0x5   :  { %s1192_s16 = smov 0   ;;  %s1194_s17 = smov 0  }
   0x6   :  { %s1196_s18 = smov 0   ;;  %s1198_s19 = smov 0  }
   0x7 LB: > { %s27_s20 = sadd.s32 1, %s1144_s17  ;;  %s30_s21 = sadd.s32 1, %s1148_s18  ;;  %s1152_s19 = sphi %s1198_s19, %s18_s19   ;;  %s1148_s18 = sphi %s1196_s18, %s1545_s18   ;;  %s1144_s17 = sphi %s1194_s17, %s1544_s17   ;;  %s1140_s16 = sphi %s1192_s16, %s1543_s16   ;;  %s1136_s15 = sphi %s1190_s15, %s1542_s15   ;;  %s1132_s14 = sphi %s1188_s14, %s1541_s14   ;;  %s1128_s13 = sphi %s1186_s13, %s1540_s13   ;;  %s1124_s12 = sphi %s1184_s12, %s1539_s12  }
   0x8   : > { %p28_p0 = scmp.ge.s32.totalorder %s27_s20, 3  ;;  %s37_s22 = sadd.s32 1, %s1132_s14 }
   0x9   : > { %p44_p1 = scmp.ne.s32.totalorder %s1132_s14, %s1128_s13  ;;  %p45_p2 = scmp.eq.s32.totalorder %s1152_s19, 0 }
   0xa   : > { %s1547_s20 = smov (%p28_p0, %s27_s20), 0  ;;  %s1549_s21 = smov (!%p28_p0, %s30_s21), %s1148_s18 }
   0xb   : > { %s34_s23 = ssub.s32 %s1144_s17, %s1547_s20  ;;  %p46_p3 = por %p45_p2, %p44_p1 }
   0xc   : > { %p32_p4 = scmp.ge.s32.totalorder %s1549_s21, 8  ;;  %p35_p5 = scmp.eq.s32.totalorder %s34_s23, 0 }
   0xd   : > { %p884_p6 = scmp.lt.s32.totalorder %s1152_s19, 24  ;;  %s155_s25 = sand.u32 1, %s1152_s19  }
   0xe   : > { %s1551_s21 = smov (%p32_p4, %s1549_s21), 0  ;;  %s157_s26 = sand.u32 1, %s1132_s14  }
   0xf   : > { %s1238_s24 = scalar_select %p35_p5, %s1132_s14, %s37_s22  }
  0x10   : > { %s858_s27 = smul.u32 384, %s157_s26  ;;  %s680_s28 = sshll.u32 %s1144_s17, 7 }
  0x11   : > { %s1251_s4 = scalar_lea.hbm %s1519_s0, %s680_s28  ;;  %p1253_p7 = pnand %p884_p6, %p46_p3 }
  0x12   : > { %s159_s6 = scalar_lea.vmem [#allocation3], %s858_s27  ;;  %s1259_s8 = scalar_lea.sflag [#allocation4], %s155_s25 }
  0x13   : > { %s165_s7 = sshll.u32 %s159_s6, 4  ;;  %s960_s9 = scalar_lea.hbm %s1251_s4, 6144  ;;  %s1257_s7 = int_to_ptr.vmem [resolvable:$true] %s165_s7 }
  0x14   : > { %p961_p8 = scmp.ne.s32.totalorder %s1251_s4, %s960_s9  ;;  %p962_p9 = pneg %p1253_p7 }
  0x15   : > { %s965_s22 = scalar_lea.hbm %s1519_s0, 18432  ;;  %p966_p12 = scmp.lt.u32.totalorder %s1251_s4, %s1519_s0 }
  0x16   : > { %p963_p10 = pnand %p962_p9, %p961_p8  ;;  %p967_p13 = scmp.lt.u32.totalorder %s965_s22, %s960_s9 }
  0x17   : > { %p969_p1 = scmp.lt.u32.totalorder %s960_s9, %s1251_s4 }
  0x18   : > { %p964_p11 = pneg %p963_p10  ;;  %p968_p0 = por %p967_p13, %p966_p12 }
  0x1a   : > { %p970_p2 = por %p969_p1, %p968_p0 }
  0x1c   : > { %p971_p3 = pnand %p970_p2, %p964_p11 }
  0x1e   : > { %974 = shalt.err (!%p971_p3)
}
  0x1f   : > { %s975_s25 = scalar_lea.vmem %s1257_s7, 6144  ;;  %s1154_s27 = smov [#allocation3]  }
  0x20   : > { %p976_p4 = scmp.ne.s32.totalorder %s1257_s7, %s975_s25  ;;  %s980_s30 = sshll.u32 %s1154_s27, 4  ;;  %s981_s30 = int_to_ptr.vmem [resolvable:$false] %s980_s30 }
  0x21   : > { %s982_s6 = scalar_lea.vmem %s981_s30, 12288  ;;  %p983_p8 = scmp.lt.s32.totalorder %s1257_s7, %s981_s30 }
  0x22   : > { %p978_p5 = pnand %p976_p4, %p962_p9  ;;  %p984_p10 = scmp.lt.s32.totalorder %s982_s6, %s975_s25 }
  0x24   : > { %p979_p6 = pneg %p978_p5  ;;  %p985_p12 = por %p984_p10, %p983_p8 }
  0x26   : > { %p986_p13 = pnand %p985_p12, %p979_p6 }
  0x28   : > { %989 = shalt.err (!%p986_p13)
}
  0x29   : > { %s1523_s9 = smov 384   ;;  %s1156_s10 = smov 128  }
  0x2a   : > { %s1157_s11 = smov 8   ;;  %s681_s22 = sshll.u32 %s157_s26, 5 }
  0x2b   : > { %879 = dma.hbm_to_vmem [thread:$0]  (!%p1253_p7), %s1251_s4, 6144, %s1257_s7, %s1259_s8, %s1523_s9, %s1156_s10, %s1157_s11  }
  0x2c   : > { %s1297_s25 = scalar_lea.hbm %s1521_s2, %s680_s28  ;;  %s179_s27 = scalar_lea.vmem [#allocation8], %s681_s22 }
  0x2d   : > { %s185_s30 = sshll.u32 %s179_s27, 4  ;;  %s1300_s6 = sadd.s32 4294967295, %s1152_s19   ;;  %s1321_s30 = int_to_ptr.vmem [resolvable:$true] %s185_s30 }
  0x2e   : > { %p50_p11 = scmp.ne.s32.totalorder %s1128_s13, %s1124_s12  ;;  %p1525_p0 = scmp.eq.s32.totalorder %s1300_s6, 0 }
  0x2f   : > { %p677_p1 = scmp.ge.s32.totalorder %s1152_s19, 1  ;;  %p129_p2 = scmp.lt.s32.totalorder %s1152_s19, 25 }
  0x30   : > { %p1309_p3 = por %p1525_p0, %p50_p11  ;;  %s1158_s4 = smov [#allocation6]  }
  0x31   : > { %p1313_p4 = pnand %p677_p1, %p129_p2  ;;  %s141_s7 = sshll.u32 %s1158_s4, 4  ;;  %s1317_s7 = int_to_ptr.vmem [resolvable:$true] %s141_s7 }
  0x32   : > { %s1529_s26 = scalar_select %p1309_p3, 1, 0 }
  0x33   : > { %s1530_s28 = scalar_select %p1313_p4, 1, 0 }
  0x34   : > { %s990_s12 = scalar_lea.hbm %s1297_s25, 512  ;;  %s995_s29 = scalar_lea.hbm %s1521_s2, 1536 }
  0x35   : > { %p991_p6 = scmp.ne.s32.totalorder %s1297_s25, %s990_s12  ;;  %p996_p12 = scmp.lt.u32.totalorder %s1297_s25, %s1521_s2 }
  0x36   : > { %p997_p13 = scmp.lt.u32.totalorder %s995_s29, %s990_s12  ;;  %p999_p1 = scmp.lt.u32.totalorder %s990_s12, %s1297_s25 }
  0x37   : > { %p993_p8 = pnand %p991_p6, %p962_p9 }
  0x38   : > { %p998_p11 = por %p997_p13, %p996_p12 }
  0x39   : > { %p994_p10 = pneg %p993_p8 }
  0x3a   : > { %p1000_p2 = por %p999_p1, %p998_p11 }
  0x3c   : > { %p1001_p5 = pnand %p1000_p2, %p994_p10 }
  0x3e   : > { %1004 = shalt.err (!%p1001_p5)
}
  0x3f   : > { %s1005_s4 = scalar_lea.vmem %s1321_s30, 512  ;;  %s1159_s22 = smov [#allocation8]  }
  0x40   : > { %p1006_p6 = scmp.ne.s32.totalorder %s1321_s30, %s1005_s4  ;;  %s1010_s23 = sshll.u32 %s1159_s22, 4  ;;  %s1011_s23 = int_to_ptr.vmem [resolvable:$false] %s1010_s23 }
  0x41   : > { %s1012_s9 = scalar_lea.vmem %s1011_s23, 1024  ;;  %p1013_p3 = scmp.lt.s32.totalorder %s1321_s30, %s1011_s23 }
  0x42   : > { %p1008_p8 = pnand %p1006_p6, %p962_p9  ;;  %p1014_p12 = scmp.lt.s32.totalorder %s1012_s9, %s1005_s4 }
  0x44   : > { %p1009_p0 = pneg %p1008_p8  ;;  %p1015_p13 = por %p1014_p12, %p1013_p3 }
  0x46   : > { %p1016_p11 = pnand %p1015_p13, %p1009_p0 }
  0x48   : > { %1019 = shalt.err (!%p1016_p11)
}
  0x49   : > { %s1531_s12 = smov 384   ;;  %p1532_p9 = scmp.eq.s32.totalorder %s1300_s6, 0 }
  0x4a   : > { %882 = dma.hbm_to_vmem [thread:$0]  (!%p1253_p7), %s1297_s25, 512, %s1321_s30, %s1259_s8, %s1531_s12, %s1156_s10, %s1157_s11  }
  0x4b   : > { %p1533_p5 = pneg %p1313_p4  ;;  %s1020_s5 = scalar_lea.hbm %s1520_s1, 1536 }
  0x4c   : > { %p1021_p0 = scmp.ne.s32.totalorder %s1520_s1, %s1020_s5  ;;  %p1027_p2 = scmp.lt.u32.totalorder %s1020_s5, %s1520_s1 }
  0x4d   : > { %p1355_p10 = pnand %p1533_p5, %p1532_p9 }
  0x4f   : > { %p1022_p3 = pneg %p1355_p10 }
  0x51   : > { %p1023_p1 = pnand %p1022_p3, %p1021_p0 }
  0x53   : > { %p1024_p7 = pneg %p1023_p1 }
  0x55   : > { %p1029_p6 = pnand %p1027_p2, %p1024_p7 }
  0x57   : > { %1032 = shalt.err (!%p1029_p6)
}
  0x58   : > { %s1033_s11 = scalar_lea.vmem %s1317_s7, 1536  ;;  %p1041_p11 = scmp.lt.s32.totalorder %s1317_s7, %s1317_s7 }
  0x59   : > { %p1034_p8 = scmp.ne.s32.totalorder %s1317_s7, %s1033_s11  ;;  %p1042_p9 = scmp.lt.s32.totalorder %s1033_s11, %s1033_s11 }
  0x5b   : > { %p1036_p12 = pnand %p1034_p8, %p1022_p3  ;;  %p1043_p5 = por %p1042_p9, %p1041_p11 }
  0x5d   : > { %p1037_p13 = pneg %p1036_p12 }
  0x5f   : > { %p1044_p4 = pnand %p1043_p5, %p1037_p13 }
  0x61   : > { %1047 = shalt.err (!%p1044_p4)
}
  0x62   : > { %s1160_s25 = smov 24   ;;  %p1535_p0 = scmp.ne.s32.totalorder %s1530_s28, 0 }
  0x63   : > { %875 = dma.hbm_to_vmem [thread:$0]  (!%p1355_p10), %s1520_s1, 1536, %s1317_s7, [#allocation7], %s1531_s12, %s1531_s12, %s1160_s25  }
  0x64   : > { %197 = sbr.rel (%p1535_p0) target bundleno = 427 (0x1ab), region = 32  ;;  %s199_s27 = sand.u32 (!%p1535_p0), 1, %s1300_s6  }
  0x65   : > { %s201_s4 = sand.u32 (!%p1535_p0), 1, %s1128_s13   ;;  %s200_s22 = scalar_lea.sflag (!%p1535_p0), [#allocation4], %s199_s27 }
  0x66   : > { %s859_s5 = smul.u32 (!%p1535_p0), 384, %s201_s4  ;;  %p1536_p4 = scmp.ne.s32.totalorder (!%p1535_p0), %s1529_s26, 0 }
  0x68   : > { %s1386_s23 = scalar_lea.vmem (!%p1535_p0), [#allocation3], %s859_s5 }
  0x6b   : > { %1107 = dma.done.wait (%p1536_p4), %s200_s22, 6144  }
  0x6c   : > { %1109 = vsyncadd (%p1536_p4), %s200_s22, 4294961152  ;;  %p1537_p3 = scmp.eq.s32.totalorder %s1300_s6, 0 }
  0x6e   : > { %1111 = dma.done.wait (%p1537_p3), [#allocation7], 1536   ;;  %p1538_p10 = pmov %p1537_p3 }
  0x6f   : > { %s685_s28 = sshll.u32 %s201_s4, 5 }
  0x70   : > { %1113 = vsyncadd (%p1538_p10), [#allocation7], 4294965760  ;;  %s1396_s7 = scalar_lea.vmem [#allocation8], %s685_s28 }
  0x71   : > { %1115 = dma.done.wait (%p1536_p4), %s200_s22, 512  }
  0x72   : > { %1117 = vsyncadd (%p1536_p4), %s200_s22, 4294966784  ;;  %p239_p1 = scmp.eq.s32.totalorder %s1140_s16, 0  ;;  %p240_p7 = scmp.eq.s32.totalorder %s1136_s15, 0 }
  0x74   : > { %p241_p2 = pnand %p240_p7, %p239_p1 }
  0x75   : > { %v245_v0 = vld [vmem:[#allocation6] sm:$0xff] (!%p241_p2)  ;;  %v246_v1 = vld [vmem:[#allocation6 + $0x8] sm:$0xff] (!%p241_p2)  ;;  %v247_v2 = vld [vmem:[#allocation6 + $0x10] sm:$0xff] (!%p241_p2) }
  0x76   : > { %244 = sbr.rel (%p241_p2) target bundleno = 130 (0x82), region = 48  ;;  %257 = vst [vmem:[#allocation9] sm:$0xff] (!%p241_p2), %v245_v0  ;;  %269 = vst [vmem:[#allocation2] sm:$0xff] (!%p241_p2), %v245_v0  ;;  %v248_v3 = vld [vmem:[#allocation6 + $0x18] sm:$0xff] (!%p241_p2)  ;;  %v249_v4 = vld [vmem:[#allocation6 + $0x20] sm:$0xff] (!%p241_p2) }
  0x77   : > { %258 = vst [vmem:[#allocation9 + $0x8] sm:$0xff] (!%p241_p2), %v246_v1  ;;  %270 = vst [vmem:[#allocation2 + $0x8] sm:$0xff] (!%p241_p2), %v246_v1  ;;  %v250_v5 = vld [vmem:[#allocation6 + $0x28] sm:$0xff] (!%p241_p2)  ;;  %v251_v6 = vld [vmem:[#allocation6 + $0x30] sm:$0xff] (!%p241_p2) }
  0x78   : > { %259 = vst [vmem:[#allocation9 + $0x10] sm:$0xff] (!%p241_p2), %v247_v2  ;;  %271 = vst [vmem:[#allocation2 + $0x10] sm:$0xff] (!%p241_p2), %v247_v2  ;;  %v252_v7 = vld [vmem:[#allocation6 + $0x38] sm:$0xff] (!%p241_p2)  ;;  %v253_v8 = vld [vmem:[#allocation6 + $0x40] sm:$0xff] (!%p241_p2) }
  0x79   : > { %260 = vst [vmem:[#allocation9 + $0x18] sm:$0xff] (!%p241_p2), %v248_v3  ;;  %272 = vst [vmem:[#allocation2 + $0x18] sm:$0xff] (!%p241_p2), %v248_v3  ;;  %v254_v9 = vld [vmem:[#allocation6 + $0x48] sm:$0xff] (!%p241_p2)  ;;  %v255_v10 = vld [vmem:[#allocation6 + $0x50] sm:$0xff] (!%p241_p2) }
  0x7a   : > { %261 = vst [vmem:[#allocation9 + $0x20] sm:$0xff] (!%p241_p2), %v249_v4  ;;  %273 = vst [vmem:[#allocation2 + $0x20] sm:$0xff] (!%p241_p2), %v249_v4  ;;  %v256_v11 = vld [vmem:[#allocation6 + $0x58] sm:$0xff] (!%p241_p2) }
  0x7b   : > { %262 = vst [vmem:[#allocation9 + $0x28] sm:$0xff] (!%p241_p2), %v250_v5  ;;  %274 = vst [vmem:[#allocation2 + $0x28] sm:$0xff] (!%p241_p2), %v250_v5 }
  0x7c   : > { %263 = vst [vmem:[#allocation9 + $0x30] sm:$0xff] (!%p241_p2), %v251_v6  ;;  %275 = vst [vmem:[#allocation2 + $0x30] sm:$0xff] (!%p241_p2), %v251_v6 }
  0x7d   : > { %264 = vst [vmem:[#allocation9 + $0x38] sm:$0xff] %v252_v7  ;;  %276 = vst [vmem:[#allocation2 + $0x38] sm:$0xff] %v252_v7 }
  0x7e   : > { %265 = vst [vmem:[#allocation9 + $0x40] sm:$0xff] %v253_v8  ;;  %277 = vst [vmem:[#allocation2 + $0x40] sm:$0xff] %v253_v8 }
  0x7f   : > { %266 = vst [vmem:[#allocation9 + $0x48] sm:$0xff] %v254_v9  ;;  %278 = vst [vmem:[#allocation2 + $0x48] sm:$0xff] %v254_v9 }
  0x80   : > { %267 = vst [vmem:[#allocation9 + $0x50] sm:$0xff] %v255_v10  ;;  %279 = vst [vmem:[#allocation2 + $0x50] sm:$0xff] %v255_v10 }
  0x81   : > { %268 = vst [vmem:[#allocation9 + $0x58] sm:$0xff] %v256_v11  ;;  %280 = vst [vmem:[#allocation2 + $0x58] sm:$0xff] %v256_v11 }
  0x82 PF: > { %p281_p6 = scmp.gt.s32.totalorder %s1140_s16, 0 }
  0x84   : > { %p282_p8 = pnand %p281_p6, %p240_p7 }
  0x85   : > { %v286_v12 = vld [vmem:[#allocation9] sm:$0xff] (!%p282_p8)  ;;  %v287_v13 = vld [vmem:[#allocation9 + $0x8] sm:$0xff] (!%p282_p8)  ;;  %v288_v14 = vld [vmem:[#allocation9 + $0x10] sm:$0xff] (!%p282_p8) }
  0x86   : > { %285 = sbr.rel (%p282_p8) target bundleno = 141 (0x8d), region = 52  ;;  %298 = vst [vmem:[#allocation2] sm:$0xff] (!%p282_p8), %v286_v12  ;;  %299 = vst [vmem:[#allocation2 + $0x8] sm:$0xff] (!%p282_p8), %v287_v13  ;;  %v289_v15 = vld [vmem:[#allocation9 + $0x18] sm:$0xff] (!%p282_p8)  ;;  %v290_v16 = vld [vmem:[#allocation9 + $0x20] sm:$0xff] (!%p282_p8) }
  0x87   : > { %300 = vst [vmem:[#allocation2 + $0x10] sm:$0xff] (!%p282_p8), %v288_v14  ;;  %v291_v17 = vld [vmem:[#allocation9 + $0x28] sm:$0xff] (!%p282_p8)  ;;  %301 = vst [vmem:[#allocation2 + $0x18] sm:$0xff] (!%p282_p8), %v289_v15  ;;  %v294_v20 = vld [vmem:[#allocation9 + $0x40] sm:$0xff] (!%p282_p8) }
  0x88   : > { %302 = vst [vmem:[#allocation2 + $0x20] sm:$0xff] (!%p282_p8), %v290_v16  ;;  %303 = vst [vmem:[#allocation2 + $0x28] sm:$0xff] (!%p282_p8), %v291_v17  ;;  %v292_v18 = vld [vmem:[#allocation9 + $0x30] sm:$0xff] (!%p282_p8)  ;;  %v295_v21 = vld [vmem:[#allocation9 + $0x48] sm:$0xff] (!%p282_p8) }
  0x89   : > { %v293_v19 = vld [vmem:[#allocation9 + $0x38] sm:$0xff] (!%p282_p8)  ;;  %304 = vst [vmem:[#allocation2 + $0x30] sm:$0xff] (!%p282_p8), %v292_v18  ;;  %306 = vst [vmem:[#allocation2 + $0x40] sm:$0xff] (!%p282_p8), %v294_v20  ;;  %v296_v22 = vld [vmem:[#allocation9 + $0x50] sm:$0xff] (!%p282_p8) }
  0x8a   : > { %305 = vst [vmem:[#allocation2 + $0x38] sm:$0xff] (!%p282_p8), %v293_v19  ;;  %v297_v23 = vld [vmem:[#allocation9 + $0x58] sm:$0xff] (!%p282_p8)  ;;  %307 = vst [vmem:[#allocation2 + $0x48] sm:$0xff] (!%p282_p8), %v295_v21 }
  0x8b   : > { %308 = vst [vmem:[#allocation2 + $0x50] sm:$0xff] (!%p282_p8), %v296_v22  ;;  %309 = vst [vmem:[#allocation2 + $0x58] sm:$0xff] (!%p282_p8), %v297_v23 }
  0x8d PF: > { %v339_v24 = vld [vmem:[%s1386_s23 + $0x80] sm:$0xff]  ;;  %v340_v25 = vld [vmem:[%s1386_s23 + $0x88] sm:$0xff]  ;;  %v341_v33 = vld [vmem:[%s1386_s23 + $0x90] sm:$0xff]  ;;  %s686_s16 = sshll.u32 %s1136_s15, 7  ;;  %s1161_s15 = smov [#allocation9]  }
  0x8e   : > { %v323_v26 = vld [vmem:[%s1386_s23] sm:$0xff]  ;;  %v794_v27 = vpack.c.bf16 %v340_v25, %v339_v24  ;;  %v324_v28 = vld [vmem:[%s1386_s23 + $0x8] sm:$0xff]  ;;  %v342_v34 = vld [vmem:[%s1386_s23 + $0x98] sm:$0xff]  ;;  %s541_s26 = sshra.s32 %s686_s16, 7  ;;  %s579_s8 = sshll.u32 %s1161_s15, 4  ;;  %s580_s8 = int_to_ptr.vmem [resolvable:$true] %s579_s8 }
  0x8f   : > { %v355_v29 = vld [vmem:[%s1386_s23 + $0x100] sm:$0xff]  ;;  %v356_v30 = vld [vmem:[%s1386_s23 + $0x108] sm:$0xff]  ;;  %v796_v31 = vpack.c.bf16 %v324_v28, %v323_v26  ;;  %v325_v35 = vld [vmem:[%s1386_s23 + $0x10] sm:$0xff]  ;;  %v798_v36 = vpack.c.bf16 %v342_v34, %v341_v33  ;;  %s687_s12 = sshll.u32 %s541_s26, 3  ;;  %p886_p12 = scmp.eq.s32.totalorder %s1300_s6, 23 }
  0x90   : > { %v826_v32 = vpack.c.bf16 %v356_v30, %v355_v29  ;;  %795 = vmatprep.subr.bf16.mxu0 %v794_v27  ;;  %v326_v37 = vld [vmem:[%s1386_s23 + $0x18] sm:$0xff]  ;;  %v357_v38 = vld [vmem:[%s1386_s23 + $0x110] sm:$0xff]  ;;  %v343_v42 = vld [vmem:[%s1386_s23 + $0xa0] sm:$0xff]  ;;  %s1458_s29 = scalar_lea.vmem [#allocation9], %s687_s12  ;;  %s1048_s10 = scalar_lea.vmem %s580_s8, 1536 }
  0x91   : > { %v358_v39 = vld [vmem:[%s1386_s23 + $0x118] sm:$0xff]  ;;  %797 = vmatpush3.bf16.msra.mxu0 %v796_v31  ;;  %v800_v40 = vpack.c.bf16 %v326_v37, %v325_v35  ;;  %v344_v43 = vld [vmem:[%s1386_s23 + $0xa8] sm:$0xff]  ;;  %v327_v44 = vld [vmem:[%s1386_s23 + $0x20] sm:$0xff]  ;;  %p1049_p13 = scmp.ne.s32.totalorder %s580_s8, %s1048_s10  ;;  %p1055_p5 = scmp.lt.s32.totalorder %s580_s8, %s580_s8 }
  0x92   : > { %827 = vmatprep.subr.bf16.mxu1 %v826_v32  ;;  %v830_v41 = vpack.c.bf16 %v358_v39, %v357_v38  ;;  %799 = vmatprep.subr.bf16.mxu0 %v798_v36  ;;  %v802_v45 = vpack.c.bf16 %v344_v43, %v343_v42  ;;  %v328_v46 = vld [vmem:[%s1386_s23 + $0x28] sm:$0xff]  ;;  %v359_v47 = vld [vmem:[%s1386_s23 + $0x120] sm:$0xff]  ;;  %v345_v50 = vld [vmem:[%s1386_s23 + $0xb0] sm:$0xff]  ;;  %p1056_p0 = scmp.lt.s32.totalorder %s1048_s10, %s1048_s10 }
  0x93   : > { %829 = vmatpush3.bf16.msra.mxu1 %v826_v32  ;;  %v360_v48 = vld [vmem:[%s1386_s23 + $0x128] sm:$0xff]  ;;  %v346_v51 = vld [vmem:[%s1386_s23 + $0xb8] sm:$0xff]  ;;  %v361_v52 = vld [vmem:[%s1386_s23 + $0x130] sm:$0xff]  ;;  %v804_v54 = vpack.c.bf16 %v328_v46, %v327_v44  ;;  %p1050_p11 = pnand %p1049_p13, %p886_p12 }
  0x94   : > { %831 = vmatprep.subr.bf16.mxu1 %v830_v41  ;;  %v834_v49 = vpack.c.bf16 %v360_v48, %v359_v47  ;;  %v362_v53 = vld [vmem:[%s1386_s23 + $0x138] sm:$0xff]  ;;  %v806_v55 = vpack.c.bf16 %v346_v51, %v345_v50  ;;  %v329_v56 = vld [vmem:[%s1386_s23 + $0x30] sm:$0xff]  ;;  %v347_v59 = vld [vmem:[%s1386_s23 + $0xc0] sm:$0xff]  ;;  %p1057_p4 = por %p1056_p0, %p1055_p5 }
  0x95   : > { %801 = vmatpush3.bf16.msra.mxu0 %v800_v40  ;;  %v330_v57 = vld [vmem:[%s1386_s23 + $0x38] sm:$0xff]  ;;  %v838_v58 = vpack.c.bf16 %v362_v53, %v361_v52  ;;  %v348_v60 = vld [vmem:[%s1386_s23 + $0xc8] sm:$0xff]  ;;  %v363_v61 = vld [vmem:[%s1386_s23 + $0x140] sm:$0xff]  ;;  %p1051_p9 = pneg %p1050_p11 }
  0x96   : > { %803 = vmatprep.subr.bf16.mxu0 %v802_v45  ;;  %v364_v62 = vld [vmem:[%s1386_s23 + $0x148] sm:$0xff]  ;;  %v808_v63 = vpack.c.bf16 %v330_v57, %v329_v56  ;;  %v810_v0 = vpack.c.bf16 %v348_v60, %v347_v59  ;;  %v331_v1 = vld [vmem:[%s1386_s23 + $0x40] sm:$0xff]  ;;  %v349_v4 = vld [vmem:[%s1386_s23 + $0xd0] sm:$0xff] }
  0x97   : > { %833 = vmatpush3.bf16.msra.mxu1 %v830_v41  ;;  %v332_v2 = vld [vmem:[%s1386_s23 + $0x48] sm:$0xff]  ;;  %v842_v3 = vpack.c.bf16 %v364_v62, %v363_v61  ;;  %v350_v5 = vld [vmem:[%s1386_s23 + $0xd8] sm:$0xff]  ;;  %v365_v6 = vld [vmem:[%s1386_s23 + $0x150] sm:$0xff]  ;;  %p1058_p3 = pnand %p1057_p4, %p1051_p9 }
  0x98   : > { %835 = vmatprep.subr.bf16.mxu1 %v834_v49  ;;  %v366_v7 = vld [vmem:[%s1386_s23 + $0x158] sm:$0xff]  ;;  %v812_v8 = vpack.c.bf16 %v332_v2, %v331_v1  ;;  %v312_v9 = vld [vmem:[#allocation2 + $0x8] sm:$0xff]  ;;  %v313_v10 = vld [vmem:[#allocation2 + $0x10] sm:$0xff]  ;;  %v814_v11 = vpack.c.bf16 %v350_v5, %v349_v4 }
  0x99   : > { %805 = vmatpush3.bf16.msra.mxu0 %v804_v54  ;;  %v333_v12 = vld [vmem:[%s1386_s23 + $0x50] sm:$0xff]  ;;  %v334_v13 = vld [vmem:[%s1386_s23 + $0x58] sm:$0xff]  ;;  %v846_v14 = vpack.c.bf16 %v366_v7, %v365_v6  ;;  %v351_v15 = vld [vmem:[%s1386_s23 + $0xe0] sm:$0xff]  ;;  %435 = vmatprep.mubr.f32.mxu0 %v312_v9 }
  0x9a   : > { %807 = vmatprep.subr.bf16.mxu0 %v806_v55  ;;  %v352_v16 = vld [vmem:[%s1386_s23 + $0xe8] sm:$0xff]  ;;  %v367_v17 = vld [vmem:[%s1386_s23 + $0x160] sm:$0xff]  ;;  %788 = vmatprep.mubr.f32.mxu1 %v313_v10  ;;  %v816_v19 = vpack.c.bf16 %v334_v13, %v333_v12  ;;  %v353_v24 = vld [vmem:[%s1386_s23 + $0xf0] sm:$0xff] }
  0x9b   : > { %837 = vmatpush3.bf16.msra.mxu1 %v834_v49  ;;  %v368_v18 = vld [vmem:[%s1386_s23 + $0x168] sm:$0xff]  ;;  %v818_v20 = vpack.c.bf16 %v352_v16, %v351_v15  ;;  %v335_v21 = vld [vmem:[%s1386_s23 + $0x60] sm:$0xff]  ;;  %v354_v25 = vld [vmem:[%s1386_s23 + $0xf8] sm:$0xff] }
  0x9c   : > { %839 = vmatprep.subr.bf16.mxu1 %v838_v58  ;;  %v336_v22 = vld [vmem:[%s1386_s23 + $0x68] sm:$0xff]  ;;  %v850_v23 = vpack.c.bf16 %v368_v18, %v367_v17  ;;  %v369_v26 = vld [vmem:[%s1386_s23 + $0x170] sm:$0xff]  ;;  %v370_v27 = vld [vmem:[%s1386_s23 + $0x178] sm:$0xff]  ;;  %v822_v29 = vpack.c.bf16 %v354_v25, %v353_v24 }
  0x9d   : > { %809 = vmatpush3.bf16.msra.mxu0 %v808_v63  ;;  %v820_v28 = vpack.c.bf16 %v336_v22, %v335_v21  ;;  %v337_v30 = vld [vmem:[%s1386_s23 + $0x70] sm:$0xff]  ;;  %v338_v31 = vld [vmem:[%s1386_s23 + $0x78] sm:$0xff]  ;;  %v854_v32 = vpack.c.bf16 %v370_v27, %v369_v26  ;;  %v311_v34 = vld [vmem:[#allocation2] sm:$0xff] }
  0x9e   : > { %811 = vmatprep.subr.bf16.mxu0 %v810_v0  ;;  %v824_v33 = vpack.c.bf16 %v338_v31, %v337_v30  ;;  %v316_v35 = vld [vmem:[#allocation2 + $0x28] sm:$0xff]  ;;  %v315_v36 = vld [vmem:[#allocation2 + $0x20] sm:$0xff]  ;;  %v314_v38 = vld [vmem:[#allocation2 + $0x18] sm:$0xff] }
  0x9f   : > { %841 = vmatpush3.bf16.msra.mxu1 %v838_v58  ;;  %v319_v37 = vld [vmem:[#allocation2 + $0x40] sm:$0xff]  ;;  %v318_v39 = vld [vmem:[#allocation2 + $0x38] sm:$0xff]  ;;  %v317_v41 = vld [vmem:[#allocation2 + $0x30] sm:$0xff] }
  0xa0   : > { %843 = vmatprep.subr.bf16.mxu1 %v842_v3  ;;  %v322_v40 = vld [vmem:[#allocation2 + $0x58] sm:$0xff]  ;;  %v321_v42 = vld [vmem:[#allocation2 + $0x50] sm:$0xff]  ;;  %v320_v43 = vld [vmem:[#allocation2 + $0x48] sm:$0xff] }
  0xa1   : > { %813 = vmatpush3.bf16.msra.mxu0 %v812_v8  ;;  %v545_v47 = vld [vmem:[%s1458_s29] sm:$0xff]  ;;  %v546_v54 = vld [vmem:[%s1458_s29 + $0x18] sm:$0xff]  ;;  %v547_v1 = vld [vmem:[%s1458_s29 + $0x30] sm:$0xff] }
  0xa2   : > { %815 = vmatprep.subr.bf16.mxu0 %v814_v11  ;;  %v549_v51 = vmul.f32 0.5, %v545_v47  ;;  %v561_v59 = vld [vmem:[%s1396_s7] sm:$0xff]  ;;  %v550_v62 = vmul.f32 0.5, %v546_v54  ;;  %v562_v5 = vld [vmem:[%s1396_s7 + $0x8] sm:$0xff]  ;;  %v551_v8 = vmul.f32 0.5, %v547_v1  ;;  %v563_v15 = vld [vmem:[%s1396_s7 + $0x10] sm:$0xff] }
  0xa3   : > { %845 = vmatpush3.bf16.msra.mxu1 %v842_v3  ;;  %v548_v11 = vld [vmem:[%s1458_s29 + $0x48] sm:$0xff]  ;;  %v564_v21 = vld [vmem:[%s1396_s7 + $0x18] sm:$0xff] }
  0xa4   : > { %847 = vmatprep.subr.bf16.mxu1 %v846_v14  ;;  %v552_v18 = vmul.f32 0.5, %v548_v11 }
  0xa5   : > { %817 = vmatpush3.bf16.msra.mxu0 %v816_v19 }
  0xa6   : > { %819 = vmatprep.subr.bf16.mxu0 %v818_v20 }
  0xa7   : > { %849 = vmatpush3.bf16.msra.mxu1 %v846_v14 }
  0xa8   : > { %851 = vmatprep.subr.bf16.mxu1 %v850_v23 }
  0xa9   : > { %821 = vmatpush3.bf16.msra.mxu0 %v820_v28 }
  0xaa   : > { %823 = vmatprep.subr.bf16.mxu0 %v822_v29 }
  0xab   : > { %853 = vmatpush3.bf16.msra.mxu1 %v850_v23 }
  0xac   : > { %855 = vmatprep.subr.bf16.mxu1 %v854_v32 }
  0xad   : > { %825 = vmatpush3.bf16.msra.mxu0 %v824_v33 }
  0xaf   : > { %857 = vmatpush3.bf16.msra.mxu1 %v854_v32 }
  0xb0   : > { %436 = vmatmul.mubr.f32.vlgmr.msra.gmra.mrb[0].mxu0 %v311_v34 }
  0xb1   : > { %440 = vmatprep.mubr.f32.mxu0 %v315_v36 }
  0xb2   : > { %789 = vmatmul.mubr.f32.vlgmr.msra.gmra.mrb[0].mxu1 %v316_v35 }
  0xb3   : > { %791 = vmatprep.mubr.f32.mxu1 %v319_v37 }
  0xb4   : > { %441 = vmatmul.mubr.f32.gmra.mrb[2].mxu0 %v314_v38 }
  0xb5   : > { %445 = vmatprep.mubr.f32.mxu0 %v318_v39 }
  0xb6   : > { %792 = vmatmul.mubr.f32.gmra.mrb[2].mxu1 %v322_v40 }
  0xb8   : > { %446 = vmatmul.mubr.f32.gmra.mrb[4].mxu0 %v317_v41 }
  0xb9   : > { %450 = vmatprep.mubr.f32.mxu0 %v321_v42 }
  0xbc   : > { %451 = vmatmul.mubr.f32.gmra.mrb[6].mxu0 %v320_v43 }
 0x183   : > { %v724_v44 = vpop.f32.mrb[0].mxu0 }
 0x184   : > { %v725_v45 = vpop.f32.mrb[1].mxu0 }
 0x185   : > { %v790_v46 = vpop.f32.mrb[0].mxu1  ;;  %v726_v48 = vadd.f32 %v725_v45, %v724_v44 }
 0x186   : > { %v522_v49 = vpop.f32.mrb[1].mxu1 }
 0x187   : > { %v523_v50 = vadd.f32 %v726_v48, %v522_v49  ;;  %v727_v52 = vpop.f32.mrb[2].mxu0 }
 0x188   : > { %v728_v53 = vpop.f32.mrb[3].mxu0 }
 0x189   : > { %v793_v55 = vpop.f32.mrb[2].mxu1  ;;  %v553_v56 = vmul.f32 0.5, %v523_v50  ;;  %v729_v57 = vadd.f32 %v728_v53, %v727_v52 }
 0x18a   : > { %v532_v58 = vpop.f32.mrb[3].mxu1 }
 0x18b   : > { %v557_v60 = vadd.f32 %v553_v56, %v549_v51  ;;  %v528_v61 = vadd.f32 %v790_v46, %v729_v57  ;;  %v730_v63 = vpop.f32.mrb[4].mxu0 }
 0x18c   : > { %v731_v0 = vpop.f32.mrb[5].mxu0 }
 0x18d   : > { %v565_v2 = vadd.f32 %v561_v59, %v557_v60  ;;  %v554_v3 = vmul.f32 0.5, %v528_v61  ;;  %v732_v4 = vadd.f32 %v731_v0, %v730_v63 }
 0x18f   : > { %569 = vst [vmem:[%s1458_s29] sm:$0xff] %v565_v2  ;;  %v558_v6 = vadd.f32 %v554_v3, %v550_v62  ;;  %v533_v7 = vadd.f32 %v732_v4, %v532_v58  ;;  %v733_v9 = vpop.f32.mrb[6].mxu0 }
 0x190   : > { %v734_v10 = vpop.f32.mrb[7].mxu0 }
 0x191   : > { %v566_v12 = vadd.f32 %v562_v5, %v558_v6  ;;  %v555_v13 = vmul.f32 0.5, %v533_v7  ;;  %v735_v14 = vadd.f32 %v734_v10, %v733_v9 }
 0x193   : > { %570 = vst [vmem:[%s1458_s29 + $0x18] sm:$0xff] %v566_v12  ;;  %v559_v16 = vadd.f32 %v555_v13, %v551_v8  ;;  %v538_v17 = vadd.f32 %v793_v55, %v735_v14 }
 0x195   : > { %v567_v19 = vadd.f32 %v563_v15, %v559_v16  ;;  %v556_v20 = vmul.f32 0.5, %v538_v17 }
 0x197   : > { %571 = vst [vmem:[%s1458_s29 + $0x30] sm:$0xff] %v567_v19  ;;  %v560_v22 = vadd.f32 %v556_v20, %v552_v18 }
 0x199   : > { %v568_v23 = vadd.f32 %v564_v21, %v560_v22 }
 0x19b   : > { %572 = vst [vmem:[%s1458_s29 + $0x48] sm:$0xff] %v568_v23 }
 0x19c   : > { %1061 = shalt.err (!%p1058_p3)
}
 0x19d   : > { %s1062_s30 = scalar_lea.hbm %s1522_s3, 1536 }
 0x19e   : > { %p1063_p10 = scmp.ne.s32.totalorder %s1522_s3, %s1062_s30  ;;  %p1068_p2 = scmp.lt.u32.totalorder %s1062_s30, %s1522_s3 }
 0x1a0   : > { %p1064_p1 = pnand %p1063_p10, %p886_p12 }
 0x1a2   : > { %p1065_p7 = pneg %p1064_p1 }
 0x1a4   : > { %p1070_p6 = pnand %p1068_p2, %p1065_p7 }
 0x1a6   : > { %1073 = shalt.err (!%p1070_p6)
}
 0x1a7   : > { %s1162_s22 = smov 384   ;;  %s1163_s23 = smov 24  }
 0x1a8   : > { %869 = dma.vmem_to_hbm [thread:$0]  (%p886_p12), %s580_s8, 1536, %s1522_s3, [#allocation5], %s1162_s22, %s1162_s22, %s1163_s23  }
 0x1a9   : > { %1119 = dma.done.wait (%p886_p12), [#allocation5], 1536  }
 0x1aa   : > { %1121 = vsyncadd (%p886_p12), [#allocation5], 4294965760 }
 0x1ab PF: > { %s18_s19 = sadd.s32 1, %s1152_s19   ;;  %s1539_s12 = smov %s1128_s13 }
 0x1ac   : > { %p15_p8 = scmp.ge.s32.totalorder %s18_s19, 26   ;;  %s1540_s13 = smov %s1132_s14 }
 0x1ad   : > { %s1541_s14 = smov %s1238_s24  ;;  %s1542_s15 = smov %s1144_s17 }
 0x1ae   : > { %s1543_s16 = smov %s1148_s18  ;;  %s1544_s17 = smov %s1547_s20 }
 0x1af   : > { %s1545_s18 = smov %s1551_s21  ;;  %17 = sbr.rel (!%p15_p8) target bundleno = 7 (0x7), region = 93 }
 0x1b6   :  { %595 = vsyncpa [#allocation4], 1 }
 0x1b7   :  { %597 = vsyncpa [#allocation4 + $0x1], 1 }
 0x1b8   :  { %598 = vsyncpa [#allocation7], 1 }
 0x1b9   :  { %599 = vsyncpa [#allocation5], 1 }
 0x1ba   :  { %601 = vsyncpa [#allocation5 + $0x1], 1 }

</bundles_post_ra>
